<compile_context>
chip_gen: v7x
topology: tpu7x:2x2x1
jax: 0.10.0
libtpu: 0.0.40
codegen_flags: <defaults>
</compile_context>

<pallas_src>
import functools

import jax
import jax.numpy as jnp
from jax.experimental import pallas as pl
from jax.experimental.pallas import tpu as pltpu


# ----------------------------------------------------------------------------
# Fused kernel: trunk (1x1 conv + ReLU) -> GAP accumulate -> heads -> final fc
# ----------------------------------------------------------------------------
def _fused_two_stream_kernel(hw_total,
                             x1_ref, x2_ref,
                             wt1_ref, bt1_ref, wt2_ref, bt2_ref,
                             wh1_ref, bh1_ref, wh2_ref, bh2_ref,
                             wf_ref, bf_ref,
                             o_ref,
                             acc1_ref, acc2_ref):
    """Grid = (B, n_hw_tiles).

    x1_ref/x2_ref : (Cin, T)        spatial positions on the lane axis
    wt*_ref       : (Cmid, Cin)     1x1-conv trunk stand-in weights
    bt*_ref       : (Cmid, 1)
    wh*_ref       : (inner, Cmid)   replaced fc heads (PyTorch (out, in) layout)
    bh*_ref       : (inner, 1)
    wf_ref        : (classes, 2*inner), bf_ref: (classes, 1)
    o_ref         : (classes, 1)    per-batch output block
    acc*_ref      : (Cmid, 1)       GAP sum accumulators (VMEM scratch)
    """
    t = pl.program_id(1)

    @pl.when(t == 0)
    def _():
        acc1_ref[...] = jnp.zeros_like(acc1_ref)
        acc2_ref[...] = jnp.zeros_like(acc2_ref)

    x1 = x1_ref[...]                    # (Cin, T)
    x2 = x2_ref[...]
    wt1 = wt1_ref[...]                  # (Cmid, Cin)
    wt2 = wt2_ref[...]
    cin = x1.shape[0]

    # Trunk stand-in: relu(W @ x + b). Cin is tiny, so contract on the VPU
    # with unrolled broadcast-FMAs instead of a near-empty MXU matmul.
    y1 = bt1_ref[...]                   # (Cmid, 1) -> broadcasts to (Cmid, T)
    y2 = bt2_ref[...]
    for k in range(cin):                # static unroll
        y1 = y1 + wt1[:, k:k + 1] * x1[k:k + 1, :]
        y2 = y2 + wt2[:, k:k + 1] * x2[k:k + 1, :]
    y1 = jnp.maximum(y1, 0.0)
    y2 = jnp.maximum(y2, 0.0)

    # Global-average-pool accumulation (lane reduction -> column vector).
    acc1_ref[...] += jnp.sum(y1, axis=1, keepdims=True)
    acc2_ref[...] += jnp.sum(y2, axis=1, keepdims=True)

    # Final spatial tile for this batch element: run the heads + final fc.
    @pl.when(t == pl.num_programs(1) - 1)
    def _():
        inner = wh1_ref.shape[0]
        inv_hw = jnp.float32(1.0 / hw_total)
        p1 = acc1_ref[...] * inv_hw     # (Cmid, 1)  == GAP output
        p2 = acc2_ref[...] * inv_hw

        # Replaced fc heads: Linear(Cmid -> inner), column form.
        h1 = jnp.dot(wh1_ref[...], p1,
                     preferred_element_type=jnp.float32) + bh1_ref[...]
        h2 = jnp.dot(wh2_ref[...], p2,
                     preferred_element_type=jnp.float32) + bh2_ref[...]

        # fc(cat((h1, h2), 1)) == Wf[:, :inner] @ h1 + Wf[:, inner:] @ h2 + bf
        wf = wf_ref[...]                # (classes, 2*inner)
        out = (jnp.dot(wf[:, :inner], h1, preferred_element_type=jnp.float32)
               + jnp.dot(wf[:, inner:], h2, preferred_element_type=jnp.float32)
               + bf_ref[...])           # (classes, 1)
        o_ref[...] = out.astype(o_ref.dtype)


# ----------------------------------------------------------------------------
# Wrapper
# ----------------------------------------------------------------------------
def _choose_tile_hw(hw, target=1024):
    """Largest spatial tile <= target that is a multiple of 128 and divides hw."""
    if hw <= target:
        return hw
    t = (min(target, hw) // 128) * 128
    while t >= 128:
        if hw % t == 0:
            return t
        t -= 128
    return hw                            # fallback: no clean tiling -> full


def baseline_net_forward(x1, x2, params, tile_hw=None):
    """x1, x2: NCHW float32 inputs (fundus image, OCT image)."""
    B, C, H, W = x1.shape
    hw = H * W
    if (tile_hw is None or hw % tile_hw != 0
            or (tile_hw != hw and tile_hw % 128 != 0)):
        tile_hw = _choose_tile_hw(hw)
    n_hw = hw // tile_hw

    # NCHW -> (B, C, H*W): pure reshape (no transpose); spatial on lanes.
    x1 = x1.reshape(B, C, hw)
    x2 = x2.reshape(B, C, hw)

    wt1, bt1 = params["w_t1"], params["b_t1"]
    wt2, bt2 = params["w_t2"], params["b_t2"]
    wh1, bh1 = params["w_h1"], params["b_h1"]
    wh2, bh2 = params["w_h2"], params["b_h2"]
    wf, bf = params["w_f"], params["b_f"]

    cmid = wt1.shape[0]
    num_classes = wf.shape[0]

    def full(a):                         # whole-array, grid-invariant block
        return pl.BlockSpec(a.shape, lambda b, t, _n=a.ndim: (0,) * _n)

    x_spec = pl.BlockSpec((None, C, tile_hw), lambda b, t: (b, 0, t))

    out = pl.pallas_call(
        functools.partial(_fused_two_stream_kernel, float(hw)),
        out_shape=jax.ShapeDtypeStruct((B, num_classes, 1), jnp.float32),
        grid_spec=pltpu.PrefetchScalarGridSpec(
            num_scalar_prefetch=0,
            grid=(B, n_hw),
            in_specs=[x_spec, x_spec,
                      full(wt1), full(bt1), full(wt2), full(bt2),
                      full(wh1), full(bh1), full(wh2), full(bh2),
                      full(wf), full(bf)],
            out_specs=pl.BlockSpec((None, num_classes, 1),
                                   lambda b, t: (b, 0, 0)),
            scratch_shapes=[pltpu.VMEM((cmid, 1), jnp.float32),
                            pltpu.VMEM((cmid, 1), jnp.float32)],
        ),
        compiler_params=pltpu.CompilerParams(
            dimension_semantics=("parallel", "arbitrary")),
    )(x1, x2, wt1, bt1, wt2, bt2, wh1, bh1, wh2, bh2, wf, bf)

    return out.reshape(B, num_classes)   # drop trailing singleton


# ----------------------------------------------------------------------------
# Parameters (PyTorch (out_features, in_features) layout) and a JAX reference
# ----------------------------------------------------------------------------
def init_params(key, cin=3, cmid=32, inner_feature=32, num_classes=8):
    ks = jax.random.split(key, 8)
    s = 0.05
    return {
        # trunk stand-ins (model1 / model2)  TODO(synk): real backbones omitted
        "w_t1": s * jax.random.normal(ks[0], (cmid, cin), jnp.float32),
        "b_t1": s * jax.random.normal(ks[1], (cmid, 1), jnp.float32),
        "w_t2": s * jax.random.normal(ks[2], (cmid, cin), jnp.float32),
        "b_t2": s * jax.random.normal(ks[3], (cmid, 1), jnp.float32),
        # replaced fc heads: Linear(cmid -> inner_feature)
        "w_h1": s * jax.random.normal(ks[4], (inner_feature, cmid), jnp.float32),
        "b_h1": jnp.zeros((inner_feature, 1), jnp.float32),
        "w_h2": s * jax.random.normal(ks[5], (inner_feature, cmid), jnp.float32),
        "b_h2": jnp.zeros((inner_feature, 1), jnp.float32),
        # final fc: Linear(2*inner_feature -> num_classes)
        "w_f": s * jax.random.normal(ks[6], (num_classes, 2 * inner_feature),
                                     jnp.float32),
        "b_f": s * jax.random.normal(ks[7], (num_classes, 1), jnp.float32),
    }


def _reference_forward(x1, x2, params):
    """Pure-JAX reference for correctness checking."""
    B, C, H, W = x1.shape

    def trunk(x, w, b):
        xm = x.reshape(B, C, H * W)
        y = jnp.einsum("mc,bcs->bms", w, xm) + b[None, :, :]
        y = jnp.maximum(y, 0.0)
        return jnp.mean(y, axis=2)                       # GAP -> (B, Cmid)

    p1 = trunk(x1, params["w_t1"], params["b_t1"])
    p2 = trunk(x2, params["w_t2"], params["b_t2"])
    h1 = p1 @ params["w_h1"].T + params["b_h1"][:, 0]
    h2 = p2 @ params["w_h2"].T + params["b_h2"][:, 0]
    h = jnp.concatenate([h1, h2], axis=1)
    return h @ params["w_f"].T + params["b_f"][:, 0]


if __name__ == "__main__":
    key = jax.random.PRNGKey(0)
    k_x1, k_x2, k_p = jax.random.split(key, 3)

    B, C, H, W = 2, 3, 16, 16
    x1 = jax.random.normal(k_x1, (B, C, H, W), jnp.float32)   # fundus image
    x2 = jax.random.normal(k_x2, (B, C, H, W), jnp.float32)   # OCT image

    params = init_params(k_p, cin=C, cmid=32, inner_feature=32, num_classes=8)

    # tile_hw=128 -> grid (B, 2): exercises the multi-step GAP accumulation.
    fwd = jax.jit(functools.partial(baseline_net_forward, tile_hw=128))
    out = fwd(x1, x2, params)
    jax.block_until_ready(out)

    ref = _reference_forward(x1, x2, params)
    assert out.shape == (B, 8) and out.dtype == jnp.float32
    assert jnp.allclose(out, ref, atol=1e-4, rtol=1e-4)
    print("KERNEL_OK")
</pallas_src>

<mosaic_0001>
module attributes {stable_mosaic.version = 11 : i64} {
  func.func @_fused_two_stream_kernel(%arg0: i32, %arg1: i32, %arg2: memref<1x3x128xf32, #tpu.memory_space<vmem>>, %arg3: memref<1x3x128xf32, #tpu.memory_space<vmem>>, %arg4: memref<32x3xf32, #tpu.memory_space<vmem>>, %arg5: memref<32x1xf32, #tpu.memory_space<vmem>>, %arg6: memref<32x3xf32, #tpu.memory_space<vmem>>, %arg7: memref<32x1xf32, #tpu.memory_space<vmem>>, %arg8: memref<32x32xf32, #tpu.memory_space<vmem>>, %arg9: memref<32x1xf32, #tpu.memory_space<vmem>>, %arg10: memref<32x32xf32, #tpu.memory_space<vmem>>, %arg11: memref<32x1xf32, #tpu.memory_space<vmem>>, %arg12: memref<8x64xf32, #tpu.memory_space<vmem>>, %arg13: memref<8x1xf32, #tpu.memory_space<vmem>>, %arg14: memref<1x8x1xf32, #tpu.memory_space<vmem>>, %arg15: memref<32x1xf32, #tpu.memory_space<vmem>>, %arg16: memref<32x1xf32, #tpu.memory_space<vmem>>) attributes {dimension_semantics = [#tpu.dimension_semantics<parallel>, #tpu.dimension_semantics<arbitrary>], iteration_bounds = array<i64: 2, 2>, scalar_prefetch = 0 : i64, scratch_operands = 2 : i64, tpu.core_type = #tpu.core_type<tc>, window_params = [{transform_indices = @transform_0, window_bounds = array<i64: 1, 3, 128>}, {transform_indices = @transform_1, window_bounds = array<i64: 1, 3, 128>}, {pipeline_mode = #tpu.pipeline_mode<synchronous>, transform_indices = @transform_2, window_bounds = array<i64: 32, 3>}, {pipeline_mode = #tpu.pipeline_mode<synchronous>, transform_indices = @transform_3, window_bounds = array<i64: 32, 1>}, {pipeline_mode = #tpu.pipeline_mode<synchronous>, transform_indices = @transform_4, window_bounds = array<i64: 32, 3>}, {pipeline_mode = #tpu.pipeline_mode<synchronous>, transform_indices = @transform_5, window_bounds = array<i64: 32, 1>}, {pipeline_mode = #tpu.pipeline_mode<synchronous>, transform_indices = @transform_6, window_bounds = array<i64: 32, 32>}, {pipeline_mode = #tpu.pipeline_mode<synchronous>, transform_indices = @transform_7, window_bounds = array<i64: 32, 1>}, {pipeline_mode = #tpu.pipeline_mode<synchronous>, transform_indices = @transform_8, window_bounds = array<i64: 32, 32>}, {pipeline_mode = #tpu.pipeline_mode<synchronous>, transform_indices = @transform_9, window_bounds = array<i64: 32, 1>}, {pipeline_mode = #tpu.pipeline_mode<synchronous>, transform_indices = @transform_10, window_bounds = array<i64: 8, 64>}, {pipeline_mode = #tpu.pipeline_mode<synchronous>, transform_indices = @transform_11, window_bounds = array<i64: 8, 1>}, {transform_indices = @transform_12, window_bounds = array<i64: 1, 8, 1>}]} {
    %c0_i32 = arith.constant 0 : i32
    %0 = arith.cmpi eq, %arg1, %c0_i32 : i32
    %1 = arith.extui %0 : i1 to i32
    %c0_i32_0 = arith.constant 0 : i32
    %2 = arith.cmpi ne, %1, %c0_i32_0 : i32
    scf.if %2 {
      %cst_26 = arith.constant 0.000000e+00 : f32
      %66 = vector.broadcast %cst_26 : f32 to vector<32x1xf32>
      %c0_27 = arith.constant 0 : index
      %c0_28 = arith.constant 0 : index
      %67 = vector.load %arg15[%c0_27, %c0_28] : memref<32x1xf32, #tpu.memory_space<vmem>>, vector<32x1xf32>
      tpu.vector_store %arg15[%c0_27, %c0_28], %66 {strides = array<i32>} : memref<32x1xf32, #tpu.memory_space<vmem>>, vector<32x1xf32>,
      %cst_29 = arith.constant 0.000000e+00 : f32
      %68 = vector.broadcast %cst_29 : f32 to vector<32x1xf32>
      %c0_30 = arith.constant 0 : index
      %c0_31 = arith.constant 0 : index
      %69 = vector.load %arg16[%c0_30, %c0_31] : memref<32x1xf32, #tpu.memory_space<vmem>>, vector<32x1xf32>
      tpu.vector_store %arg16[%c0_30, %c0_31], %68 {strides = array<i32>} : memref<32x1xf32, #tpu.memory_space<vmem>>, vector<32x1xf32>,
    } else {
    }
    %c0 = arith.constant 0 : index
    %c0_1 = arith.constant 0 : index
    %c0_2 = arith.constant 0 : index
    %3 = vector.load %arg2[%c0, %c0_1, %c0_2] : memref<1x3x128xf32, #tpu.memory_space<vmem>>, vector<1x3x128xf32>
    %4 = vector.shape_cast %3 : vector<1x3x128xf32> to vector<3x128xf32>
    %c0_3 = arith.constant 0 : index
    %c0_4 = arith.constant 0 : index
    %c0_5 = arith.constant 0 : index
    %5 = vector.load %arg3[%c0_3, %c0_4, %c0_5] : memref<1x3x128xf32, #tpu.memory_space<vmem>>, vector<1x3x128xf32>
    %6 = vector.shape_cast %5 : vector<1x3x128xf32> to vector<3x128xf32>
    %c0_6 = arith.constant 0 : index
    %c0_7 = arith.constant 0 : index
    %7 = vector.load %arg4[%c0_6, %c0_7] : memref<32x3xf32, #tpu.memory_space<vmem>>, vector<32x3xf32>
    %c0_8 = arith.constant 0 : index
    %c0_9 = arith.constant 0 : index
    %8 = vector.load %arg6[%c0_8, %c0_9] : memref<32x3xf32, #tpu.memory_space<vmem>>, vector<32x3xf32>
    %c0_10 = arith.constant 0 : index
    %c0_11 = arith.constant 0 : index
    %9 = vector.load %arg5[%c0_10, %c0_11] : memref<32x1xf32, #tpu.memory_space<vmem>>, vector<32x1xf32>
    %c0_12 = arith.constant 0 : index
    %c0_13 = arith.constant 0 : index
    %10 = vector.load %arg7[%c0_12, %c0_13] : memref<32x1xf32, #tpu.memory_space<vmem>>, vector<32x1xf32>
    %11 = vector.extract_strided_slice %7 {offsets = [0, 0], sizes = [32, 1], strides = [1, 1]} : vector<32x3xf32> to vector<32x1xf32>
    %12 = vector.extract_strided_slice %4 {offsets = [0, 0], sizes = [1, 128], strides = [1, 1]} : vector<3x128xf32> to vector<1x128xf32>
    %13 = vector.broadcast %11 : vector<32x1xf32> to vector<32x128xf32>
    %14 = vector.broadcast %12 : vector<1x128xf32> to vector<32x128xf32>
    %15 = arith.mulf %13, %14 : vector<32x128xf32>
    %16 = vector.broadcast %9 : vector<32x1xf32> to vector<32x128xf32>
    %17 = arith.addf %16, %15 : vector<32x128xf32>
    %18 = vector.extract_strided_slice %8 {offsets = [0, 0], sizes = [32, 1], strides = [1, 1]} : vector<32x3xf32> to vector<32x1xf32>
    %19 = vector.extract_strided_slice %6 {offsets = [0, 0], sizes = [1, 128], strides = [1, 1]} : vector<3x128xf32> to vector<1x128xf32>
    %20 = vector.broadcast %18 : vector<32x1xf32> to vector<32x128xf32>
    %21 = vector.broadcast %19 : vector<1x128xf32> to vector<32x128xf32>
    %22 = arith.mulf %20, %21 : vector<32x128xf32>
    %23 = vector.broadcast %10 : vector<32x1xf32> to vector<32x128xf32>
    %24 = arith.addf %23, %22 : vector<32x128xf32>
    %25 = vector.extract_strided_slice %7 {offsets = [0, 1], sizes = [32, 1], strides = [1, 1]} : vector<32x3xf32> to vector<32x1xf32>
    %26 = vector.extract_strided_slice %4 {offsets = [1, 0], sizes = [1, 128], strides = [1, 1]} : vector<3x128xf32> to vector<1x128xf32>
    %27 = vector.broadcast %25 : vector<32x1xf32> to vector<32x128xf32>
    %28 = vector.broadcast %26 : vector<1x128xf32> to vector<32x128xf32>
    %29 = arith.mulf %27, %28 : vector<32x128xf32>
    %30 = arith.addf %17, %29 : vector<32x128xf32>
    %31 = vector.extract_strided_slice %8 {offsets = [0, 1], sizes = [32, 1], strides = [1, 1]} : vector<32x3xf32> to vector<32x1xf32>
    %32 = vector.extract_strided_slice %6 {offsets = [1, 0], sizes = [1, 128], strides = [1, 1]} : vector<3x128xf32> to vector<1x128xf32>
    %33 = vector.broadcast %31 : vector<32x1xf32> to vector<32x128xf32>
    %34 = vector.broadcast %32 : vector<1x128xf32> to vector<32x128xf32>
    %35 = arith.mulf %33, %34 : vector<32x128xf32>
    %36 = arith.addf %24, %35 : vector<32x128xf32>
    %37 = vector.extract_strided_slice %7 {offsets = [0, 2], sizes = [32, 1], strides = [1, 1]} : vector<32x3xf32> to vector<32x1xf32>
    %38 = vector.extract_strided_slice %4 {offsets = [2, 0], sizes = [1, 128], strides = [1, 1]} : vector<3x128xf32> to vector<1x128xf32>
    %39 = vector.broadcast %37 : vector<32x1xf32> to vector<32x128xf32>
    %40 = vector.broadcast %38 : vector<1x128xf32> to vector<32x128xf32>
    %41 = arith.mulf %39, %40 : vector<32x128xf32>
    %42 = arith.addf %30, %41 : vector<32x128xf32>
    %43 = vector.extract_strided_slice %8 {offsets = [0, 2], sizes = [32, 1], strides = [1, 1]} : vector<32x3xf32> to vector<32x1xf32>
    %44 = vector.extract_strided_slice %6 {offsets = [2, 0], sizes = [1, 128], strides = [1, 1]} : vector<3x128xf32> to vector<1x128xf32>
    %45 = vector.broadcast %43 : vector<32x1xf32> to vector<32x128xf32>
    %46 = vector.broadcast %44 : vector<1x128xf32> to vector<32x128xf32>
    %47 = arith.mulf %45, %46 : vector<32x128xf32>
    %48 = arith.addf %36, %47 : vector<32x128xf32>
    %cst = arith.constant 0.000000e+00 : f32
    %49 = vector.broadcast %cst : f32 to vector<32x128xf32>
    %50 = arith.maximumf %42, %49 : vector<32x128xf32>
    %cst_14 = arith.constant 0.000000e+00 : f32
    %51 = vector.broadcast %cst_14 : f32 to vector<32x128xf32>
    %52 = arith.maximumf %48, %51 : vector<32x128xf32>
    %c0_15 = arith.constant 0 : index
    %c0_16 = arith.constant 0 : index
    %53 = vector.load %arg15[%c0_15, %c0_16] : memref<32x1xf32, #tpu.memory_space<vmem>>, vector<32x1xf32>
    %cst_17 = arith.constant dense<0.000000e+00> : vector<32xf32>
    %54 = vector.multi_reduction <add>, %50, %cst_17 [1] : vector<32x128xf32> to vector<32xf32>
    %55 = vector.shape_cast %54 : vector<32xf32> to vector<32x1xf32>
    %56 = arith.addf %53, %55 : vector<32x1xf32>
    %c0_18 = arith.constant 0 : index
    %c0_19 = arith.constant 0 : index
    %57 = vector.load %arg15[%c0_18, %c0_19] : memref<32x1xf32, #tpu.memory_space<vmem>>, vector<32x1xf32>
    tpu.vector_store %arg15[%c0_18, %c0_19], %56 {strides = array<i32>} : memref<32x1xf32, #tpu.memory_space<vmem>>, vector<32x1xf32>,
    %c0_20 = arith.constant 0 : index
    %c0_21 = arith.constant 0 : index
    %58 = vector.load %arg16[%c0_20, %c0_21] : memref<32x1xf32, #tpu.memory_space<vmem>>, vector<32x1xf32>
    %cst_22 = arith.constant dense<0.000000e+00> : vector<32xf32>
    %59 = vector.multi_reduction <add>, %52, %cst_22 [1] : vector<32x128xf32> to vector<32xf32>
    %60 = vector.shape_cast %59 : vector<32xf32> to vector<32x1xf32>
    %61 = arith.addf %58, %60 : vector<32x1xf32>
    %c0_23 = arith.constant 0 : index
    %c0_24 = arith.constant 0 : index
    %62 = vector.load %arg16[%c0_23, %c0_24] : memref<32x1xf32, #tpu.memory_space<vmem>>, vector<32x1xf32>
    tpu.vector_store %arg16[%c0_23, %c0_24], %61 {strides = array<i32>} : memref<32x1xf32, #tpu.memory_space<vmem>>, vector<32x1xf32>,
    %c1_i32 = arith.constant 1 : i32
    %63 = arith.cmpi eq, %arg1, %c1_i32 : i32
    %64 = arith.extui %63 : i1 to i32
    %c0_i32_25 = arith.constant 0 : i32
    %65 = arith.cmpi ne, %64, %c0_i32_25 : i32
    scf.if %65 {
      %c0_26 = arith.constant 0 : index
      %c0_27 = arith.constant 0 : index
      %66 = vector.load %arg15[%c0_26, %c0_27] : memref<32x1xf32, #tpu.memory_space<vmem>>, vector<32x1xf32>
      %cst_28 = arith.constant 3.906250e-03 : f32
      %67 = vector.broadcast %cst_28 : f32 to vector<32x1xf32>
      %68 = arith.mulf %66, %67 : vector<32x1xf32>
      %c0_29 = arith.constant 0 : index
      %c0_30 = arith.constant 0 : index
      %69 = vector.load %arg16[%c0_29, %c0_30] : memref<32x1xf32, #tpu.memory_space<vmem>>, vector<32x1xf32>
      %cst_31 = arith.constant 3.906250e-03 : f32
      %70 = vector.broadcast %cst_31 : f32 to vector<32x1xf32>
      %71 = arith.mulf %69, %70 : vector<32x1xf32>
      %c0_32 = arith.constant 0 : index
      %c0_33 = arith.constant 0 : index
      %72 = vector.load %arg8[%c0_32, %c0_33] : memref<32x32xf32, #tpu.memory_space<vmem>>, vector<32x32xf32>
      %cst_34 = arith.constant dense<0.000000e+00> : vector<32x1xf32>
      %73 = tpu.matmul %72, %68, %cst_34 {dimension_numbers = #tpu.dot_dimension_numbers<[1], [0], [0], [1], [0, 0, 1, 1], [], []>} : vector<32x32xf32>, vector<32x1xf32>, vector<32x1xf32> -> vector<32x1xf32>
      %c0_35 = arith.constant 0 : index
      %c0_36 = arith.constant 0 : index
      %74 = vector.load %arg9[%c0_35, %c0_36] : memref<32x1xf32, #tpu.memory_space<vmem>>, vector<32x1xf32>
      %75 = arith.addf %73, %74 : vector<32x1xf32>
      %c0_37 = arith.constant 0 : index
      %c0_38 = arith.constant 0 : index
      %76 = vector.load %arg10[%c0_37, %c0_38] : memref<32x32xf32, #tpu.memory_space<vmem>>, vector<32x32xf32>
      %cst_39 = arith.constant dense<0.000000e+00> : vector<32x1xf32>
      %77 = tpu.matmul %76, %71, %cst_39 {dimension_numbers = #tpu.dot_dimension_numbers<[1], [0], [0], [1], [0, 0, 1, 1], [], []>} : vector<32x32xf32>, vector<32x1xf32>, vector<32x1xf32> -> vector<32x1xf32>
      %c0_40 = arith.constant 0 : index
      %c0_41 = arith.constant 0 : index
      %78 = vector.load %arg11[%c0_40, %c0_41] : memref<32x1xf32, #tpu.memory_space<vmem>>, vector<32x1xf32>
      %79 = arith.addf %77, %78 : vector<32x1xf32>
      %c0_42 = arith.constant 0 : index
      %c0_43 = arith.constant 0 : index
      %80 = vector.load %arg12[%c0_42, %c0_43] : memref<8x64xf32, #tpu.memory_space<vmem>>, vector<8x64xf32>
      %81 = vector.extract_strided_slice %80 {offsets = [0, 0], sizes = [8, 32], strides = [1, 1]} : vector<8x64xf32> to vector<8x32xf32>
      %cst_44 = arith.constant dense<0.000000e+00> : vector<8x1xf32>
      %82 = tpu.matmul %81, %75, %cst_44 {dimension_numbers = #tpu.dot_dimension_numbers<[1], [0], [0], [1], [0, 0, 1, 1], [], []>} : vector<8x32xf32>, vector<32x1xf32>, vector<8x1xf32> -> vector<8x1xf32>
      %83 = vector.extract_strided_slice %80 {offsets = [0, 32], sizes = [8, 32], strides = [1, 1]} : vector<8x64xf32> to vector<8x32xf32>
      %cst_45 = arith.constant dense<0.000000e+00> : vector<8x1xf32>
      %84 = tpu.matmul %83, %79, %cst_45 {dimension_numbers = #tpu.dot_dimension_numbers<[1], [0], [0], [1], [0, 0, 1, 1], [], []>} : vector<8x32xf32>, vector<32x1xf32>, vector<8x1xf32> -> vector<8x1xf32>
      %85 = arith.addf %82, %84 : vector<8x1xf32>
      %c0_46 = arith.constant 0 : index
      %c0_47 = arith.constant 0 : index
      %86 = vector.load %arg13[%c0_46, %c0_47] : memref<8x1xf32, #tpu.memory_space<vmem>>, vector<8x1xf32>
      %87 = arith.addf %85, %86 : vector<8x1xf32>
      %c0_48 = arith.constant 0 : index
      %c0_49 = arith.constant 0 : index
      %c0_50 = arith.constant 0 : index
      %88 = vector.load %arg14[%c0_48, %c0_49, %c0_50] : memref<1x8x1xf32, #tpu.memory_space<vmem>>, vector<1x8x1xf32>
      %89 = vector.shape_cast %88 : vector<1x8x1xf32> to vector<8x1xf32>
      %90 = vector.shape_cast %87 : vector<8x1xf32> to vector<1x8x1xf32>
      tpu.vector_store %arg14[%c0_48, %c0_49, %c0_50], %90 {strides = array<i32>} : memref<1x8x1xf32, #tpu.memory_space<vmem>>, vector<1x8x1xf32>,
    } else {
    }
    return
  }
  func.func @transform_0(%arg0: i32, %arg1: i32) -> (i32, i32, i32) {
    %c0_i32 = arith.constant 0 : i32
    %c0_i32_0 = arith.constant 0 : i32
    return %arg0, %c0_i32, %arg1 : i32, i32, i32
  }
  func.func @transform_1(%arg0: i32, %arg1: i32) -> (i32, i32, i32) {
    %c0_i32 = arith.constant 0 : i32
    %c0_i32_0 = arith.constant 0 : i32
    return %arg0, %c0_i32, %arg1 : i32, i32, i32
  }
  func.func @transform_2(%arg0: i32, %arg1: i32) -> (i32, i32) {
    %c0_i32 = arith.constant 0 : i32
    %c0_i32_0 = arith.constant 0 : i32
    %c0_i32_1 = arith.constant 0 : i32
    return %c0_i32, %c0_i32_0 : i32, i32
  }
  func.func @transform_3(%arg0: i32, %arg1: i32) -> (i32, i32) {
    %c0_i32 = arith.constant 0 : i32
    %c0_i32_0 = arith.constant 0 : i32
    %c0_i32_1 = arith.constant 0 : i32
    return %c0_i32, %c0_i32_0 : i32, i32
  }
  func.func @transform_4(%arg0: i32, %arg1: i32) -> (i32, i32) {
    %c0_i32 = arith.constant 0 : i32
    %c0_i32_0 = arith.constant 0 : i32
    %c0_i32_1 = arith.constant 0 : i32
    return %c0_i32, %c0_i32_0 : i32, i32
  }
  func.func @transform_5(%arg0: i32, %arg1: i32) -> (i32, i32) {
    %c0_i32 = arith.constant 0 : i32
    %c0_i32_0 = arith.constant 0 : i32
    %c0_i32_1 = arith.constant 0 : i32
    return %c0_i32, %c0_i32_0 : i32, i32
  }
  func.func @transform_6(%arg0: i32, %arg1: i32) -> (i32, i32) {
    %c0_i32 = arith.constant 0 : i32
    %c0_i32_0 = arith.constant 0 : i32
    %c0_i32_1 = arith.constant 0 : i32
    return %c0_i32, %c0_i32_0 : i32, i32
  }
  func.func @transform_7(%arg0: i32, %arg1: i32) -> (i32, i32) {
    %c0_i32 = arith.constant 0 : i32
    %c0_i32_0 = arith.constant 0 : i32
    %c0_i32_1 = arith.constant 0 : i32
    return %c0_i32, %c0_i32_0 : i32, i32
  }
  func.func @transform_8(%arg0: i32, %arg1: i32) -> (i32, i32) {
    %c0_i32 = arith.constant 0 : i32
    %c0_i32_0 = arith.constant 0 : i32
    %c0_i32_1 = arith.constant 0 : i32
    return %c0_i32, %c0_i32_0 : i32, i32
  }
  func.func @transform_9(%arg0: i32, %arg1: i32) -> (i32, i32) {
    %c0_i32 = arith.constant 0 : i32
    %c0_i32_0 = arith.constant 0 : i32
    %c0_i32_1 = arith.constant 0 : i32
    return %c0_i32, %c0_i32_0 : i32, i32
  }
  func.func @transform_10(%arg0: i32, %arg1: i32) -> (i32, i32) {
    %c0_i32 = arith.constant 0 : i32
    %c0_i32_0 = arith.constant 0 : i32
    %c0_i32_1 = arith.constant 0 : i32
    return %c0_i32, %c0_i32_0 : i32, i32
  }
  func.func @transform_11(%arg0: i32, %arg1: i32) -> (i32, i32) {
    %c0_i32 = arith.constant 0 : i32
    %c0_i32_0 = arith.constant 0 : i32
    %c0_i32_1 = arith.constant 0 : i32
    return %c0_i32, %c0_i32_0 : i32, i32
  }
  func.func @transform_12(%arg0: i32, %arg1: i32) -> (i32, i32, i32) {
    %c0_i32 = arith.constant 0 : i32
    %c0_i32_0 = arith.constant 0 : i32
    %c0_i32_1 = arith.constant 0 : i32
    return %arg0, %c0_i32, %c0_i32_0 : i32, i32, i32
  }
}

</mosaic_0001>

<bundles_post_ra>
// kernel: baseline_net_forward.1
= control target key start
LH: loop header
LB: loop body
LE: loop exit
PB: predicated region body
PF: predicated region fallthrough
CT: control target
= control target key end

     0   :  { %s1527_s21 = smov 0   ;;  %s1529_s22 = smov 0   ;;  %s1733_s0 = inlined_call_operand.vmem [shape: f32[2,3,256], index: 0, kind: input, shape index: {}]   ;;  %s1734_s1 = inlined_call_operand.vmem [shape: f32[2,3,256], index: 1, kind: input, shape index: {}]   ;;  %s1735_s2 = inlined_call_operand.vmem [shape: f32[32,3], index: 2, kind: input, shape index: {}]   ;;  %s1736_s3 = inlined_call_operand.vmem [shape: f32[32,1], index: 3, kind: input, shape index: {}]   ;;  %s1737_s4 = inlined_call_operand.vmem [shape: f32[32,3], index: 4, kind: input, shape index: {}]   ;;  %s1738_s5 = inlined_call_operand.vmem [shape: f32[32,1], index: 5, kind: input, shape index: {}]   ;;  %s1739_s6 = inlined_call_operand.vmem [shape: f32[32,32], index: 6, kind: input, shape index: {}]   ;;  %s1740_s7 = inlined_call_operand.vmem [shape: f32[32,1], index: 7, kind: input, shape index: {}]   ;;  %s1741_s8 = inlined_call_operand.vmem [shape: f32[32,32], index: 8, kind: input, shape index: {}]   ;;  %s1742_s9 = inlined_call_operand.vmem [shape: f32[32,1], index: 9, kind: input, shape index: {}]   ;;  %s1743_s10 = inlined_call_operand.vmem [shape: f32[8,64], index: 10, kind: input, shape index: {}]   ;;  %s1744_s11 = inlined_call_operand.vmem [shape: f32[8,1], index: 11, kind: input, shape index: {}]   ;;  %s1745_s12 = inlined_call_operand.vmem [shape: f32[2,8,1], index: 12, kind: output, shape index: {}]  }
   0x1   :  { %s1531_s23 = smov 0   ;;  %s1533_s24 = smov 0  }
   0x2   :  { %s1535_s25 = smov 0  }
   0x3 LB: > { %1747 = sst [smem:[#allocation4_spill]] %s1448_s24  ;;  %s31_s26 = sadd.s32 1, %s1444_s23  ;;  %s1452_s25 = sphi %s1535_s25, %s22_s25   ;;  %s1448_s24 = sphi %s1533_s24, %s1752_s24   ;;  %s1444_s23 = sphi %s1531_s23, %s1754_s23   ;;  %s1440_s22 = sphi %s1529_s22, %s1750_s22   ;;  %s1436_s21 = sphi %s1527_s21, %s1753_s21  }
   0x4   : > { %s34_s27 = sadd.s32 1, %s1448_s24  ;;  %p32_p0 = scmp.ge.s32.totalorder %s31_s26, 2 }
   0x5   : > { %p1236_p1 = scmp.ge.s32.totalorder %s1452_s25, 1  ;;  %p394_p2 = scmp.lt.s32.totalorder %s1452_s25, 5 }
   0x6   : > { %s1756_s26 = smov (%p32_p0, %s31_s26), 0  ;;  %s1758_s27 = smov (!%p32_p0, %s34_s27), %s1448_s24 }
   0x7   : > { %1748 = sst [smem:[#allocation5_spill]] %s1756_s26  ;;  %p395_p3 = pnand %p1236_p1, %p394_p2 }
   0x8   : > { %p36_p4 = scmp.ge.s32.totalorder %s1758_s27, 2  ;;  %p446_p5 = scmp.lt.s32.totalorder (!%p395_p3), %s1440_s22, 1 }
   0x9   : > { %398 = sbr.rel (%p395_p3) target bundleno = 826 (0x33a), region = 68  ;;  %p448_p6 = scmp.lt.s32.totalorder (!%p395_p3), %s1436_s21, 1 }
   0xa   : > { %s1760_s27 = smov (%p36_p4, %s1758_s27), 0  ;;  %p1242_p7 = scmp.ne.s32.totalorder (!%p395_p3), %s1436_s21, 0 }
   0xb   : > { %1749 = sst [smem:[#allocation6_spill]] %s1760_s27 }
  0x10   : > { %s1762_s22 = smov (!%p446_p5, %s1440_s22), 1  ;;  %469 = sbr.rel (%p1242_p7) target bundleno = 23 (0x17), region = 72 }
  0x11   : > { %s449_s28 = scalar_select %p448_p6, %s1436_s21, 1 }
  0x12   : > { %s1237_s29 = sshll.u32 %s1762_s22, 1  ;;  %s1241_s30 = sshll.u32 %s1762_s22, 3  ;;  %vm470_vm0 = vcmask (!%p1242_p7), 7168   ;;  %v1454_v0 = vmov (!%p1242_p7), 0.0  }
  0x13   : > { %s451_s13 = sadd.s32 %s1237_s29, %s449_s28  ;;  %s1564_s16 = scalar_lea.vmem %s1745_s12, %s1241_s30  ;;  %471 = vst.msk [vmem:[#allocation2] sm:$0xff] (!%p1242_p7), %vm470_vm0, %v1454_v0  ;;  %472 = vst.msk [vmem:[#allocation2 + $0x8] sm:$0xff] (!%p1242_p7), %vm470_vm0, %v1454_v0 }
  0x14   : > { %s1238_s17 = sshll.u32 %s451_s13, 2  ;;  %473 = vst.msk [vmem:[#allocation2 + $0x10] sm:$0xff] (!%p1242_p7), %vm470_vm0, %v1454_v0  ;;  %474 = vst.msk [vmem:[#allocation2 + $0x18] sm:$0xff] (!%p1242_p7), %vm470_vm0, %v1454_v0 }
  0x15   : > { %s1569_s20 = scalar_lea.vmem %s1733_s0, %s1238_s17  ;;  %s1574_s24 = scalar_lea.vmem %s1734_s1, %s1238_s17  ;;  %475 = vst.msk [vmem:[#allocation3] sm:$0xff] (!%p1242_p7), %vm470_vm0, %v1454_v0  ;;  %476 = vst.msk [vmem:[#allocation3 + $0x8] sm:$0xff] (!%p1242_p7), %vm470_vm0, %v1454_v0 }
  0x16   : > { %477 = vst.msk [vmem:[#allocation3 + $0x10] sm:$0xff] (!%p1242_p7), %vm470_vm0, %v1454_v0  ;;  %478 = vst.msk [vmem:[#allocation3 + $0x18] sm:$0xff] (!%p1242_p7), %vm470_vm0, %v1454_v0 }
  0x17 PF: > { %v483_v1 = vld [vmem:[%s1735_s2 + $0x10] sm:$0xff]  ;;  %v481_v2 = vld [vmem:[%s1735_s2] sm:$0xff]  ;;  %v1455_v3 = vmov 0   ;;  %v484_v4 = vld [vmem:[%s1735_s2 + $0x18] sm:$0xff]  ;;  %v1456_v18 = vmov 1   ;;  %v1457_v19 = vmov 2   ;;  %v517_v36 = vlaneseq }
  0x18   : > { %1409 = vset.pattern.permute.xlu1 %v1455_v3  ;;  %1408 = vset.pattern.permute.xlu0 %v1455_v3  ;;  %v482_v5 = vld [vmem:[%s1735_s2 + $0x8] sm:$0xff]  ;;  %v485_v7 = vld [vmem:[%s1737_s4] sm:$0xff]  ;;  %v488_v8 = vld [vmem:[%s1737_s4 + $0x18] sm:$0xff]  ;;  %vm737_vm1 = vcmask 7168   ;;  %p1243_p8 = scmp.ne.s32.totalorder %s1436_s21, 1 }
  0x19   : > { %509 = vperm.xlu1 %1409, %v483_v1   ;;  %499 = vperm.xlu0 %1408, %v481_v2   ;;  %v486_v6 = vld [vmem:[%s1737_s4 + $0x8] sm:$0xff]  ;;  %v487_v9 = vld [vmem:[%s1737_s4 + $0x10] sm:$0xff]  ;;  %v489_v11 = vld [vmem:[%s1736_s3] sm:$0xff]  ;;  %v518_v39 = vshrl.u32 %v517_v36, 7  ;;  %vm790_vm2 = vcmask (!%p1243_p8), 261120   ;;  %s1458_s19 = smov (!%p1243_p8), 96  }
  0x1a   : > { %v490_v10 = vld [vmem:[%s1736_s3 + $0x8] sm:$0xff]  ;;  %v492_v12 = vld [vmem:[%s1736_s3 + $0x18] sm:$0xff]  ;;  %v491_v13 = vld [vmem:[%s1736_s3 + $0x10] sm:$0xff]  ;;  %vm1460_vm3 = vmmov (!%p1243_p8), 0  }
  0x1b   : > { %v494_v14 = vld [vmem:[%s1738_s5 + $0x8] sm:$0xff]  ;;  %v493_v15 = vld [vmem:[%s1738_s5] sm:$0xff]  ;;  %v496_v16 = vld [vmem:[%s1738_s5 + $0x18] sm:$0xff]  ;;  %v619_v42 = vsub.s32 1, %v518_v39  ;;  %v519_v43 = vsub.s32 0, %v518_v39  ;;  %v675_v47 = vsub.s32 2, %v518_v39 }
  0x1c   : > { %v495_v17 = vld [vmem:[%s1738_s5 + $0x10] sm:$0xff]  ;;  %v479_v46 = vld [vmem:[%s1569_s20] sm:$0x7] }
  0x1d   : > { %514 = vperm.xlu1 %1409, %v484_v4   ;;  %504 = vperm.xlu0 %1408, %v482_v5   ;;  %v480_v48 = vld [vmem:[%s1574_s24] sm:$0x7]  ;;  %v620_v49 = vrot.slane %v479_v46, %v619_v42  ;;  %v520_v50 = vrot.slane %v479_v46, %v519_v43  ;;  %v676_v55 = vrot.slane %v479_v46, %v675_v47 }
  0x1e   : > { %v572_v53 = vrot.slane %v480_v48, %v519_v43  ;;  %v648_v54 = vrot.slane %v480_v48, %v619_v42  ;;  %v704_v62 = vrot.slane %v480_v48, %v675_v47 }
  0x21   : > { %556 = vperm.xlu1 %1409, %v486_v6   ;;  %551 = vperm.xlu0 %1408, %v485_v7  }
  0x25   : > { %566 = vperm.xlu1 %1409, %v488_v8   ;;  %561 = vperm.xlu0 %1408, %v487_v9  }
  0x29   : > { %532 = vperm.xlu1 %1409, %v490_v10   ;;  %527 = vperm.xlu0 %1408, %v489_v11  }
  0x2d   : > { %542 = vperm.xlu1 %1409, %v492_v12   ;;  %537 = vperm.xlu0 %1408, %v491_v13  }
  0x31   : > { %584 = vperm.xlu1 %1409, %v494_v14   ;;  %579 = vperm.xlu0 %1408, %v493_v15  }
  0x35   : > { %594 = vperm.xlu1 %1409, %v496_v16   ;;  %589 = vperm.xlu0 %1408, %v495_v17  }
  0x39   : > { %1411 = vset.pattern.permute.xlu1 %v1456_v18  ;;  %1410 = vset.pattern.permute.xlu0 %v1456_v18 }
  0x3a   : > { %606 = vperm.xlu1 %1411, %v482_v5   ;;  %602 = vperm.xlu0 %1410, %v481_v2  }
  0x3e   : > { %610 = vperm.xlu1 %1411, %v483_v1   ;;  %614 = vperm.xlu0 %1410, %v484_v4  }
  0x42   : > { %630 = vperm.xlu1 %1411, %v485_v7   ;;  %634 = vperm.xlu0 %1410, %v486_v6  }
  0x46   : > { %638 = vperm.xlu1 %1411, %v487_v9   ;;  %642 = vperm.xlu0 %1410, %v488_v8  }
  0x4a   : > { %1412 = vset.pattern.permute.xlu1 %v1457_v19  ;;  %1413 = vset.pattern.permute.xlu0 %v1457_v19 }
  0x4b   : > { %658 = vperm.xlu1 %1412, %v481_v2   ;;  %662 = vperm.xlu0 %1413, %v482_v5  }
  0x4f   : > { %666 = vperm.xlu1 %1412, %v483_v1   ;;  %686 = vperm.xlu0 %1413, %v485_v7  }
  0x53   : > { %670 = vperm.xlu1 %1412, %v484_v4   ;;  %694 = vperm.xlu0 %1413, %v487_v9  }
  0x57   : > { %690 = vperm.xlu1 %1412, %v486_v6  }
  0x5b   : > { %698 = vperm.xlu1 %1412, %v488_v8  }
  0x98   : > { %v510_v20 = vpop.permute.xlu1 %509  ;;  %v500_v21 = vpop.permute.xlu0 %499 }
  0x99   : > { %v521_v56 = vmul.f32 %v520_v50, %v500_v21  ;;  %v523_v63 = vmul.f32 %v520_v50, %v510_v20 }
  0x9c   : > { %v515_v22 = vpop.permute.xlu1 %514  ;;  %v505_v23 = vpop.permute.xlu0 %504 }
  0x9d   : > { %v522_v57 = vmul.f32 %v520_v50, %v505_v23  ;;  %v524_v11 = vmul.f32 %v520_v50, %v515_v22 }
  0xa0   : > { %v1625_v24 = vpop.permute.xlu1 %556  ;;  %v552_v25 = vpop.permute.xlu0 %551 }
  0xa1   : > { %v573_v0 = vmul.f32 %v572_v53, %v552_v25  ;;  %v574_v22 = vmul.f32 %v572_v53, %v1625_v24 }
  0xa4   : > { %v1627_v26 = vpop.permute.xlu1 %566  ;;  %v562_v27 = vpop.permute.xlu0 %561 }
  0xa5   : > { %v575_v12 = vmul.f32 %v572_v53, %v562_v27  ;;  %v576_v47 = vmul.f32 %v572_v53, %v1627_v26  ;;  %v722_v26 = vld [vmem:[#allocation2 + $0x8] sm:$0xff]  ;;  %v721_v53 = vld [vmem:[#allocation2] sm:$0xff] }
  0xa8   : > { %v533_v28 = vpop.permute.xlu1 %532  ;;  %v528_v29 = vpop.permute.xlu0 %527 }
  0xa9   : > { %v546_v60 = vadd.f32 %v533_v28, %v522_v57  ;;  %v545_v61 = vadd.f32 %v528_v29, %v521_v56 }
  0xac   : > { %v543_v30 = vpop.permute.xlu1 %542  ;;  %v538_v31 = vpop.permute.xlu0 %537 }
  0xad   : > { %v547_v9 = vadd.f32 %v538_v31, %v523_v63  ;;  %v548_v29 = vadd.f32 %v543_v30, %v524_v11  ;;  %v743_v11 = vld [vmem:[#allocation3 + $0x8] sm:$0xff] }
  0xb0   : > { %v1629_v32 = vpop.permute.xlu1 %584  ;;  %v580_v33 = vpop.permute.xlu0 %579 }
  0xb1   : > { %v597_v10 = vadd.f32 %v580_v33, %v573_v0  ;;  %v598_v46 = vadd.f32 %v1629_v32, %v574_v22 }
  0xb4   : > { %v1631_v34 = vpop.permute.xlu1 %594  ;;  %v590_v35 = vpop.permute.xlu0 %589 }
  0xb5   : > { %v599_v36 = vadd.f32 %v590_v35, %v575_v12  ;;  %v600_v56 = vadd.f32 %v1631_v34, %v576_v47  ;;  %v723_v34 = vld [vmem:[#allocation2 + $0x10] sm:$0xff] }
  0xb6   : > { %v784_v47 = vld [vmem:[%s1739_s6 + $0x10] sm:$0xff] (!%p1243_p8) }
  0xb9   : > { %v607_v37 = vpop.permute.xlu1 %606  ;;  %v603_v38 = vpop.permute.xlu0 %602 }
  0xba   : > { %v622_v58 = vmul.f32 %v620_v49, %v607_v37  ;;  %v621_v59 = vmul.f32 %v620_v49, %v603_v38 }
  0xbc   : > { %v626_v5 = vadd.f32 %v622_v58, %v546_v60  ;;  %v625_v6 = vadd.f32 %v621_v59, %v545_v61 }
  0xbd   : > { %v611_v40 = vpop.permute.xlu1 %610  ;;  %v615_v41 = vpop.permute.xlu0 %614 }
  0xbe   : > { %v623_v1 = vmul.f32 %v620_v49, %v611_v40  ;;  %v624_v16 = vmul.f32 %v620_v49, %v615_v41 }
  0xc0   : > { %v627_v15 = vadd.f32 %v623_v1, %v547_v9  ;;  %v628_v27 = vadd.f32 %v624_v16, %v548_v29  ;;  %v742_v1 = vld [vmem:[#allocation3] sm:$0xff] }
  0xc1   : > { %v631_v44 = vpop.permute.xlu1 %630  ;;  %v635_v45 = vpop.permute.xlu0 %634 }
  0xc2   : > { %v649_v2 = vmul.f32 %v648_v54, %v631_v44  ;;  %v650_v37 = vmul.f32 %v648_v54, %v635_v45 }
  0xc4   : > { %v653_v17 = vadd.f32 %v649_v2, %v597_v10  ;;  %v654_v48 = vadd.f32 %v650_v37, %v598_v46  ;;  %v782_v37 = vld [vmem:[%s1739_s6] sm:$0xff] (!%p1243_p8) }
  0xc5   : > { %v639_v51 = vpop.permute.xlu1 %638  ;;  %v643_v52 = vpop.permute.xlu0 %642  ;;  %1290 = vmatprep.mubr.msk.f32.mxu0 (!%p1243_p8), %vm790_vm2, %v782_v37  ;;  %v1659_v46 = vld [vmem:[%s1743_s10] sm:$0xff] (!%p1243_p8) }
  0xc6   : > { %v651_v18 = vmul.f32 %v648_v54, %v639_v51  ;;  %v652_v24 = vmul.f32 %v648_v54, %v643_v52 }
  0xc8   : > { %v655_v38 = vadd.f32 %v651_v18, %v599_v36  ;;  %v656_v58 = vadd.f32 %v652_v24, %v600_v56  ;;  %v891_v24 = vld [vmem:[%s1741_s8 + $0x18] sm:$0xff] (!%p1243_p8)  ;;  %v893_v56 = vld [vmem:[%s1742_s9 + $0x8] sm:$0xff] (!%p1243_p8) }
  0xca   : > { %v659_v3 = vpop.permute.xlu1 %658  ;;  %v663_v4 = vpop.permute.xlu0 %662 }
  0xcb   : > { %v677_v7 = vmul.f32 %v676_v55, %v659_v3  ;;  %v678_v8 = vmul.f32 %v676_v55, %v663_v4 }
  0xcd   : > { %v682_v13 = vadd.f32 %v678_v8, %v626_v5  ;;  %v681_v14 = vadd.f32 %v677_v7, %v625_v6  ;;  %v744_v5 = vld [vmem:[#allocation3 + $0x10] sm:$0xff]  ;;  %v724_v6 = vld [vmem:[#allocation2 + $0x18] sm:$0xff] }
  0xce   : > { %v667_v19 = vpop.permute.xlu1 %666  ;;  %v687_v20 = vpop.permute.xlu0 %686 }
  0xcf   : > { %v679_v21 = vmul.f32 %v676_v55, %v667_v19  ;;  %v705_v23 = vmul.f32 %v704_v62, %v687_v20  ;;  %v714_v25 = vmax.f32 %v682_v13, 0.0  ;;  %v713_v28 = vmax.f32 %v681_v14, 0.0  ;;  %v745_v14 = vld [vmem:[#allocation3 + $0x18] sm:$0xff] }
  0xd1   : > { %727 = vadd.xlane.f32.xlu1 %v714_v25  ;;  %725 = vadd.xlane.f32.xlu0 %v713_v28  ;;  %v709_v31 = vadd.f32 %v705_v23, %v653_v17  ;;  %v683_v33 = vadd.f32 %v679_v21, %v627_v15 }
  0xd2   : > { %v671_v39 = vpop.permute.xlu1 %670  ;;  %v695_v40 = vpop.permute.xlu0 %694 }
  0xd3   : > { %v680_v41 = vmul.f32 %v676_v55, %v671_v39  ;;  %v707_v42 = vmul.f32 %v704_v62, %v695_v40  ;;  %v717_v43 = vmax.f32 %v709_v31, 0.0  ;;  %v715_v44 = vmax.f32 %v683_v33, 0.0 }
  0xd5   : > { %746 = vadd.xlane.f32.xlu1 %v717_v43  ;;  %729 = vadd.xlane.f32.xlu0 %v715_v44  ;;  %v711_v30 = vadd.f32 %v707_v42, %v655_v38  ;;  %v684_v35 = vadd.f32 %v680_v41, %v628_v27  ;;  %v888_v41 = vld [vmem:[%s1741_s8] sm:$0xff] (!%p1243_p8) }
  0xd6   : > { %v691_v49 = vpop.permute.xlu1 %690  ;;  %1304 = vmatprep.mubr.msk.f32.mxu1 (!%p1243_p8), %vm790_vm2, %v888_v41 }
  0xd7   : > { %v706_v50 = vmul.f32 %v704_v62, %v691_v49  ;;  %v719_v45 = vmax.f32 %v711_v30, 0.0  ;;  %v716_v51 = vmax.f32 %v684_v35, 0.0  ;;  %v783_v30 = vld [vmem:[%s1739_s6 + $0x8] sm:$0xff] (!%p1243_p8)  ;;  %v785_v49 = vld [vmem:[%s1739_s6 + $0x18] sm:$0xff] (!%p1243_p8) }
  0xd8   : > { %v889_v35 = vld [vmem:[%s1741_s8 + $0x8] sm:$0xff] (!%p1243_p8) }
  0xd9   : > { %750 = vadd.xlane.f32.xlu1 %v719_v45  ;;  %731 = vadd.xlane.f32.xlu0 %v716_v51  ;;  %v710_v55 = vadd.f32 %v706_v50, %v654_v48  ;;  %v890_v48 = vld [vmem:[%s1741_s8 + $0x10] sm:$0xff] (!%p1243_p8)  ;;  %v1459_v50 = vmov (!%p1243_p8), 0.0|0.0   ;;  %v1461_v45 = vmov (!%p1243_p8), 0.0   ;;  %v787_v51 = vld [vmem:[%s1740_s7 + $0x8] sm:$0xff] (!%p1243_p8) }
  0xda   : > { %v699_v57 = vpop.permute.xlu1 %698 }
  0xdb   : > { %v708_v32 = vmul.f32 %v704_v62, %v699_v57  ;;  %v718_v59 = vmax.f32 %v710_v55, 0.0  ;;  %v786_v55 = vld [vmem:[%s1740_s7] sm:$0xff] (!%p1243_p8) }
  0xdd   : > { %748 = vadd.xlane.f32.xlu0 %v718_v59  ;;  %v712_v60 = vadd.f32 %v708_v32, %v656_v58  ;;  %v892_v58 = vld [vmem:[%s1742_s9] sm:$0xff] (!%p1243_p8) }
  0xdf   : > { %v720_v61 = vmax.f32 %v712_v60, 0.0 }
  0xe1   : > { %752 = vadd.xlane.f32.xlu0 %v720_v61 }
  0xf7   : > { %995 = vrot.lane.b32.xlu0 (!%p1243_p8), %v1659_v46, %s1458_s19 }
 0x15e   : > { %v728_v52 = vpop.xlane.xlu1 %727  ;;  %v726_v54 = vpop.xlane.xlu0 %725 }
 0x15f   : > { %v734_v63 = vadd.f32 %v728_v52, %v722_v26  ;;  %v733_v0 = vadd.f32 %v726_v54, %v721_v53  ;;  %v789_v52 = vld [vmem:[%s1740_s7 + $0x18] sm:$0xff] (!%p1243_p8) }
 0x161   : > { %739 = vst.msk [vmem:[#allocation2 + $0x8] sm:$0xff] %vm737_vm1, %v734_v63  ;;  %738 = vst.msk [vmem:[#allocation2] sm:$0xff] %vm737_vm1, %v733_v0  ;;  %v895_v63 = vld [vmem:[%s1742_s9 + $0x18] sm:$0xff] (!%p1243_p8)  ;;  %v788_v0 = vld [vmem:[%s1740_s7 + $0x10] sm:$0xff] (!%p1243_p8) }
 0x162   : > { %v747_v2 = vpop.xlane.xlu1 %746  ;;  %v730_v62 = vpop.xlane.xlu0 %729 }
 0x163   : > { %v754_v3 = vadd.f32 %v747_v2, %v742_v1  ;;  %v735_v4 = vadd.f32 %v730_v62, %v723_v34  ;;  %v894_v2 = vld [vmem:[%s1742_s9 + $0x10] sm:$0xff] (!%p1243_p8) }
 0x165   : > { %758 = vst.msk [vmem:[#allocation3] sm:$0xff] %vm737_vm1, %v754_v3  ;;  %740 = vst.msk [vmem:[#allocation2 + $0x10] sm:$0xff] %vm737_vm1, %v735_v4 }
 0x166   : > { %v751_v7 = vpop.xlane.xlu1 %750  ;;  %v732_v8 = vpop.xlane.xlu0 %731 }
 0x167   : > { %v756_v9 = vadd.f32 %v751_v7, %v744_v5  ;;  %v736_v10 = vadd.f32 %v732_v8, %v724_v6 }
 0x168   : > { %v766_v17 = vld [vmem:[#allocation2] sm:$0xff] (!%p1243_p8)  ;;  %v767_v18 = vld [vmem:[#allocation2 + $0x8] sm:$0xff] (!%p1243_p8) }
 0x169   : > { %760 = vst.msk [vmem:[#allocation3 + $0x10] sm:$0xff] %vm737_vm1, %v756_v9  ;;  %741 = vst.msk [vmem:[#allocation2 + $0x18] sm:$0xff] %vm737_vm1, %v736_v10  ;;  %v770_v20 = vmul.f32 (!%p1243_p8), 0.00390625, %v766_v17  ;;  %v771_v21 = vmul.f32 (!%p1243_p8), 0.00390625, %v767_v18 }
 0x16a   : > { %v749_v12 = vpop.xlane.xlu0 %748 }
 0x16b   : > { %v755_v13 = vadd.f32 %v749_v12, %v743_v11  ;;  %765 = sbr.rel (%p1243_p8) target bundleno = 826 (0x33a), region = 76  ;;  %v1332_v38 = vpack.c.bf16 (!%p1243_p8), %v771_v21, %v770_v20 }
 0x16c   : > { %v774_v19 = vld [vmem:[#allocation3] sm:$0xff] (!%p1243_p8)  ;;  %v768_v28 = vld [vmem:[#allocation2 + $0x10] sm:$0xff] (!%p1243_p8) }
 0x16d   : > { %759 = vst.msk [vmem:[#allocation3 + $0x8] sm:$0xff] %vm737_vm1, %v755_v13  ;;  %v778_v25 = vmul.f32 (!%p1243_p8), 0.00390625, %v774_v19  ;;  %v772_v31 = vmul.f32 (!%p1243_p8), 0.00390625, %v768_v28  ;;  %1333 = vmatprep.subr.bf16.mxu0 (!%p1243_p8), %v1332_v38 }
 0x16e   : > { %v753_v15 = vpop.xlane.xlu0 %752  ;;  %1335 = vmatpush3.bf16.msra.mxu0 (!%p1243_p8), %v1332_v38 }
 0x16f   : > { %v757_v16 = vadd.f32 %v753_v15, %v745_v14  ;;  %v1141_v15 = vld [vmem:[%s1744_s11] sm:$0xff] (!%p1243_p8) }
 0x170   : > { %v769_v29 = vld [vmem:[#allocation2 + $0x18] sm:$0xff] (!%p1243_p8)  ;;  %v776_v22 = vld [vmem:[#allocation3 + $0x10] sm:$0xff] (!%p1243_p8) }
 0x171   : > { %761 = vst.msk [vmem:[#allocation3 + $0x18] sm:$0xff] %vm737_vm1, %v757_v16  ;;  %v773_v33 = vmul.f32 (!%p1243_p8), 0.00390625, %v769_v29  ;;  %v780_v39 = vmul.f32 (!%p1243_p8), 0.00390625, %v776_v22 }
 0x172   : > { %v996_v12 = vpop.permute.xlu0 %995 }
 0x173   : > { %v1336_v43 = vpack.c.bf16 %v773_v33, %v772_v31 }
 0x174   : > { %v775_v23 = vld [vmem:[#allocation3 + $0x8] sm:$0xff] }
 0x175   : > { %v779_v36 = vmul.f32 0.00390625, %v775_v23  ;;  %1337 = vmatprep.subr.bf16.mxu0 %v1336_v43 }
 0x176   : > { %1339 = vmatpush3.bf16.msra.mxu0 %v1336_v43 }
 0x177   : > { %v1340_v42 = vpack.c.bf16 %v779_v36, %v778_v25  ;;  %1348 = vmatprep.subr.bf16.mxu0 %v1459_v50 }
 0x178   : > { %v777_v27 = vld [vmem:[#allocation3 + $0x18] sm:$0xff] }
 0x179   : > { %v781_v40 = vmul.f32 0.00390625, %v777_v27  ;;  %1341 = vmatprep.subr.bf16.mxu1 %v1340_v42  ;;  %1291 = vmatmul.mubr.msk.f32.vlgmr.msra.gmra.mrb[0].mxu0 %vm790_vm2, %v783_v30 }
 0x17a   : > { %1343 = vmatpush3.bf16.msra.mxu1 %v1340_v42  ;;  %1293 = vmatprep.mubr.msk.f32.mxu0 %vm790_vm2, %v784_v47 }
 0x17b   : > { %v1344_v44 = vpack.c.bf16 %v781_v40, %v780_v39 }
 0x17d   : > { %1345 = vmatprep.subr.bf16.mxu1 %v1344_v44  ;;  %1294 = vmatmul.mubr.msk.f32.gmra.mrb[2].mxu0 %vm790_vm2, %v785_v49 }
 0x17e   : > { %1347 = vmatpush3.bf16.msra.mxu1 %v1344_v44  ;;  %1318 = vmatprep.mubr.msk.f32.mxu0 %vm1460_vm3, %v1461_v45 }
 0x17f   : > { %1354 = vmatprep.subr.bf16.mxu1 %v1459_v50 }
 0x181   : > { %1305 = vmatmul.mubr.msk.f32.vlgmr.msra.gmra.mrb[0].mxu1 %vm790_vm2, %v889_v35 }
 0x182   : > { %1307 = vmatprep.mubr.msk.f32.mxu1 %vm790_vm2, %v890_v48 }
 0x185   : > { %1308 = vmatmul.mubr.msk.f32.gmra.mrb[2].mxu1 %vm790_vm2, %v891_v24 }
 0x186   : > { %1329 = vmatprep.mubr.msk.f32.mxu1 %vm1460_vm3, %v1461_v45 }
 0x24c   : > { %v1292_v57 = vpop.f32.mrb[0].mxu0 }
 0x24d   : > { %v875_v32 = vadd.f32 %v1292_v57, %v787_v51  ;;  %v869_v60 = vpop.f32.mrb[1].mxu0 }
 0x24e   : > { %v870_v26 = vadd.f32 %v869_v60, %v786_v55 }
 0x250   : > { %v1355_v1 = vpack.c.bf16 %v875_v32, %v870_v26  ;;  %v1295_v34 = vpop.f32.mrb[2].mxu0 }
 0x251   : > { %v885_v3 = vadd.f32 %v1295_v34, %v789_v52  ;;  %v879_v5 = vpop.f32.mrb[3].mxu0 }
 0x252   : > { %v880_v7 = vadd.f32 %v879_v5, %v788_v0  ;;  %1356 = vmatpush3.bf16.msra.mxu1 %v1355_v1 }
 0x253   : > { %1357 = vmatprep.subr.bf16.mxu1 %v1459_v50 }
 0x254   : > { %v1306_v59 = vpop.f32.mrb[0].mxu1  ;;  %v1358_v10 = vpack.c.bf16 %v885_v3, %v880_v7 }
 0x255   : > { %v980_v61 = vadd.f32 %v1306_v59, %v893_v56  ;;  %v974_v53 = vpop.f32.mrb[1].mxu1 }
 0x256   : > { %v975_v54 = vadd.f32 %v974_v53, %v892_v58  ;;  %1359 = vmatpush3.bf16.msra.mxu1 %v1358_v10 }
 0x258   : > { %v1349_v62 = vpack.c.bf16 %v980_v61, %v975_v54  ;;  %v1309_v4 = vpop.f32.mrb[2].mxu1 }
 0x259   : > { %v990_v6 = vadd.f32 %v1309_v4, %v895_v63  ;;  %v984_v8 = vpop.f32.mrb[3].mxu1  ;;  %1330 = vmatmul.mubr.msk.f32.vlgmr.msra.gmra.mrb[4].mxu1 %vm790_vm2, %v1659_v46 }
 0x25a   : > { %v985_v9 = vadd.f32 %v984_v8, %v894_v2  ;;  %1350 = vmatpush3.bf16.msra.mxu0 %v1349_v62 }
 0x25b   : > { %1351 = vmatprep.subr.bf16.mxu0 %v1459_v50 }
 0x25c   : > { %v1352_v11 = vpack.c.bf16 %v990_v6, %v985_v9 }
 0x25e   : > { %1353 = vmatpush3.bf16.msra.mxu0 %v1352_v11 }
 0x261   : > { %1319 = vmatmul.mubr.msk.f32.vlgmr.msra.gmra.mrb[4].mxu0 %vm790_vm2, %v996_v12 }
 0x32c   : > { %v1137_v13 = vpop.f32.mrb[4].mxu1 }
 0x32d   : > { %v1331_v16 = vpop.f32.mrb[5].mxu1 }
 0x334   : > { %v1065_v14 = vpop.f32.mrb[4].mxu0 }
 0x335   : > { %v1138_v17 = vadd.f32 %v1137_v13, %v1065_v14  ;;  %v1320_v18 = vpop.f32.mrb[5].mxu0 }
 0x337   : > { %v1142_v19 = vadd.f32 %v1141_v15, %v1138_v17 }
 0x339   : > { %1143 = vst.msk [vmem:[%s1564_s16] sm:$0xff] %vm737_vm1, %v1142_v19 }
 0x33a PF: > { %s22_s25 = sadd.s32 1, %s1452_s25   ;;  %s1750_s22 = sld [smem:[#allocation4_spill]] }
 0x33b   : > { %p19_p9 = scmp.ge.s32.totalorder %s22_s25, 6   ;;  %s1751_s28 = sld [smem:[#allocation5_spill]] }
 0x33c   : > { %s1752_s24 = sld [smem:[#allocation6_spill]]  ;;  %s1753_s21 = smov %s1444_s23 }
 0x33d   :  { %21 = sbr.rel (!%p19_p9) target bundleno = 3 (0x3), region = 109 }
 0x341   : > { %s1754_s23 = smov %s1751_s28 }

</bundles_post_ra>
